<compile_context>
chip_gen: v5e
topology: v5e:2x2
jax: 0.10.0
libtpu: 0.0.40
codegen_flags: <defaults>
</compile_context>

<pallas_src>
import functools

import jax
import jax.numpy as jnp
from jax import lax
from jax.experimental import pallas as pl
from jax.experimental.pallas import tpu as pltpu


def _round_up(x, m):
    return (x + m - 1) // m * m


def _single_stage_kernel(x_ref, m_ref,
                         w_in_ref, b_in_ref,
                         wd_ref, bd_ref,
                         wp_ref, bp_ref,
                         w_out_ref, b_out_ref,
                         o_ref,
                         out_scr, stack_scr,
                         *, num_layers, num_f_maps, seq_pad, seq_valid):
    """One batch element per grid step.

    x_ref : (1, D, T)  bf16 input features (T = padded length)
    m_ref : (1, 1, T)  f32 mask (zeros on padded frames)
    w_in  : (F, D) bf16, b_in: (F, 1) f32            -> conv_1x1 (input proj)
    wd    : (L, F, 3F) bf16, bd: (L, F, 1) f32       -> dilated conv, taps packed
    wp    : (L, F, F) bf16,  bp: (L, F, 1) f32       -> per-layer 1x1 conv
    w_out : (K, F) bf16, b_out: (K, 1) f32           -> conv_out
    o_ref : (1, K, T) f32
    out_scr   : (F, T)  f32  VMEM  activation carry
    stack_scr : (3F, T) bf16 VMEM  packed [left; center; right] taps
    """
    F = num_f_maps
    T = seq_pad

    m = m_ref[0]                                          # (1, T) f32
    t_idx = lax.broadcasted_iota(jnp.int32, (1, T), 1)    # time index on lanes

    # Input 1x1 conv: (F, D) @ (D, T) + (F, 1), bf16 operands -> f32 accumulate.
    out = jnp.dot(w_in_ref[...], x_ref[0],
                  preferred_element_type=jnp.float32) + b_in_ref[...]
    if seq_valid < seq_pad:
        # Padded frames must act as Conv1d zero-padding for the first dilated conv.
        out = jnp.where(t_idx < seq_valid, out, 0.0)
    out_scr[...] = out

    # DilatedResidualLayer stack (dilation = 2**l, padding = dilation -> same length).
    for l in range(num_layers):
        d = 2 ** l
        cur = out_scr[...]                                # (F, T) f32

        # left[t]  = cur[t - d] (zero padded)  -> tap k=0
        # right[t] = cur[t + d] (zero padded)  -> tap k=2
        left = jnp.where(t_idx >= d,
                         pltpu.roll(cur, shift=d % T, axis=1), 0.0)
        right = jnp.where(t_idx < T - d,
                          pltpu.roll(cur, shift=(T - d) % T, axis=1), 0.0)

        # Pack the three taps into one (3F, T) operand -> single K=3F matmul.
        stack_scr[0 * F:1 * F, :] = left.astype(jnp.bfloat16)
        stack_scr[1 * F:2 * F, :] = cur.astype(jnp.bfloat16)
        stack_scr[2 * F:3 * F, :] = right.astype(jnp.bfloat16)

        y = jnp.dot(wd_ref[l], stack_scr[...],
                    preferred_element_type=jnp.float32) + bd_ref[l]
        y = jnp.maximum(y, 0.0)                           # ReLU
        z = jnp.dot(wp_ref[l], y.astype(jnp.bfloat16),
                    preferred_element_type=jnp.float32) + bp_ref[l]
        out_scr[...] = (cur + z) * m                      # residual + mask

    # Output 1x1 conv + final mask (masks[:, 0:1, :] == m, single-channel mask).
    logits = jnp.dot(w_out_ref[...], out_scr[...].astype(jnp.bfloat16),
                     preferred_element_type=jnp.float32) + b_out_ref[...]
    o_ref[0] = logits * m


def single_stage_model(x, masks, params, *, num_layers):
    """x: (N, D, T) float32, masks: (N, 1, T) float32. Returns (N, K, T) float32."""
    N, D, T = x.shape
    F = params["w_in"].shape[0]
    K = params["w_out"].shape[0]
    L = num_layers

    # Lane-dense time axis: pad T to a multiple of 128; padded frames get mask=0.
    T_pad = max(_round_up(T, 128), 128)
    if T_pad != T:
        x = jnp.pad(x, ((0, 0), (0, 0), (0, T_pad - T)))
        masks = jnp.pad(masks, ((0, 0), (0, 0), (0, T_pad - T)))
    masks = masks.astype(jnp.float32)

    # bf16 MXU operands (f32 accumulation inside the kernel); biases stay f32.
    x_bf = x.astype(jnp.bfloat16)
    w_in = params["w_in"].astype(jnp.bfloat16)
    w_out = params["w_out"].astype(jnp.bfloat16)
    wp = params["wp"].astype(jnp.bfloat16)
    # Pack the 3 dilated taps: (L, 3, F, F) -> (L, F, 3F) so that
    # wd_packed[l, fo, k*F + fi] == wd[l, k, fo, fi]; stacked rows are
    # [left (k=0); center (k=1); right (k=2)].
    wd = jnp.transpose(params["wd"], (0, 2, 1, 3)).reshape(L, F, 3 * F)
    wd = wd.astype(jnp.bfloat16)
    b_in, bd, bp, b_out = (params["b_in"], params["bd"],
                           params["bp"], params["b_out"])

    kernel = functools.partial(_single_stage_kernel,
                               num_layers=L, num_f_maps=F,
                               seq_pad=T_pad, seq_valid=T)

    full = lambda shape: pl.BlockSpec(shape, lambda n: (0,) * len(shape))

    # VMEM budget estimate (blocks are double-buffered by default).
    est = (2 * D * T_pad * 2                                   # x (bf16)
           + 2 * 1 * T_pad * 4                                 # mask
           + 2 * K * T_pad * 4                                 # output block
           + 2 * (F * D + L * F * 3 * F + L * F * F + K * F) * 2   # bf16 weights
           + 2 * (F + 2 * L * F + K) * 4                       # f32 biases
           + F * T_pad * 4 + 3 * F * T_pad * 2)                # VMEM scratch
    vmem_limit = int(min(max(2 * est + (4 << 20), 32 << 20), 64 << 20))

    out = pl.pallas_call(
        kernel,
        out_shape=jax.ShapeDtypeStruct((N, K, T_pad), jnp.float32),
        grid=(N,),
        in_specs=[
            pl.BlockSpec((1, D, T_pad), lambda n: (n, 0, 0)),   # x
            pl.BlockSpec((1, 1, T_pad), lambda n: (n, 0, 0)),   # masks
            full((F, D)),            # w_in
            full((F, 1)),            # b_in
            full((L, F, 3 * F)),     # wd (packed taps)
            full((L, F, 1)),         # bd
            full((L, F, F)),         # wp
            full((L, F, 1)),         # bp
            full((K, F)),            # w_out
            full((K, 1)),            # b_out
        ],
        out_specs=pl.BlockSpec((1, K, T_pad), lambda n: (n, 0, 0)),
        scratch_shapes=[
            pltpu.VMEM((F, T_pad), jnp.float32),        # activation carry
            pltpu.VMEM((3 * F, T_pad), jnp.bfloat16),   # packed dilated taps
        ],
        compiler_params=pltpu.CompilerParams(
            dimension_semantics=("parallel",),
            vmem_limit_bytes=vmem_limit),
    )(x_bf, masks,
      w_in, b_in, wd, bd, wp, bp, w_out, b_out)

    return out[:, :, :T]


def init_params(key, *, num_layers, num_f_maps, dim, num_classes):
    """Deterministic synthetic parameter init (shapes match the PyTorch module).

    NOTE: when importing trained PyTorch weights, Conv1d stores the dilated-conv
    weight as (F_out, F_in, 3); permute to tap-major (3, F_out, F_in) per layer so
    tap 0 pairs with x[t-d] and tap 2 with x[t+d].
    """
    L, F, D, K = num_layers, num_f_maps, dim, num_classes
    ks = jax.random.split(key, 10)
    s = 0.1
    return {
        # conv_1x1: Conv1d(dim, F, 1)  -> weight (F, D, 1) squeezed to (F, D)
        "w_in": s * jax.random.normal(ks[0], (F, D), jnp.float32),
        "b_in": s * jax.random.normal(ks[1], (F, 1), jnp.float32),
        # per-layer conv_dilated: Conv1d(F, F, 3) -> stored as (L, 3, F, F)
        "wd": s * jax.random.normal(ks[2], (L, 3, F, F), jnp.float32),
        "bd": s * jax.random.normal(ks[3], (L, F, 1), jnp.float32),
        # per-layer conv_1x1: Conv1d(F, F, 1) -> (F, F)
        "wp": s * jax.random.normal(ks[4], (L, F, F), jnp.float32),
        "bp": s * jax.random.normal(ks[5], (L, F, 1), jnp.float32),
        # conv_out: Conv1d(F, num_classes, 1) -> (K, F)
        "w_out": s * jax.random.normal(ks[6], (K, F), jnp.float32),
        "b_out": s * jax.random.normal(ks[7], (K, 1), jnp.float32),
    }


if __name__ == "__main__":
    # Small shapes: batch=2, dim=8, num_f_maps=16, num_classes=4, T=16, num_layers=3
    N, D, F, K, T, L = 2, 8, 16, 4, 16, 3

    key = jax.random.PRNGKey(0)
    kx, km, kp = jax.random.split(key, 3)

    x = jax.random.normal(kx, (N, D, T), jnp.float32)
    # binary mask over time, single channel (broadcast over feature channels)
    masks = (jax.random.uniform(km, (N, 1, T)) > 0.2).astype(jnp.float32)

    params = init_params(kp, num_layers=L, num_f_maps=F, dim=D, num_classes=K)

    out = single_stage_model(x, masks, params, num_layers=L)
    out = jax.block_until_ready(out)
    assert out.shape == (N, K, T)
    print("KERNEL_OK")
</pallas_src>

<mosaic_0001>
module attributes {stable_mosaic.version = 11 : i64} {
  func.func @_single_stage_kernel(%arg0: i32, %arg1: memref<1x8x128xbf16, #tpu.memory_space<vmem>>, %arg2: memref<1x1x128xf32, #tpu.memory_space<vmem>>, %arg3: memref<16x8xbf16, #tpu.memory_space<vmem>>, %arg4: memref<16x1xf32, #tpu.memory_space<vmem>>, %arg5: memref<3x16x48xbf16, #tpu.memory_space<vmem>>, %arg6: memref<3x16x1xf32, #tpu.memory_space<vmem>>, %arg7: memref<3x16x16xbf16, #tpu.memory_space<vmem>>, %arg8: memref<3x16x1xf32, #tpu.memory_space<vmem>>, %arg9: memref<4x16xbf16, #tpu.memory_space<vmem>>, %arg10: memref<4x1xf32, #tpu.memory_space<vmem>>, %arg11: memref<1x4x128xf32, #tpu.memory_space<vmem>>, %arg12: memref<16x128xf32, #tpu.memory_space<vmem>>, %arg13: memref<48x128xbf16, #tpu.memory_space<vmem>>) attributes {dimension_semantics = [#tpu.dimension_semantics<parallel>], iteration_bounds = array<i64: 2>, scalar_prefetch = 0 : i64, scratch_operands = 2 : i64, tpu.core_type = #tpu.core_type<tc>, window_params = [{transform_indices = @transform_0, window_bounds = array<i64: 1, 8, 128>}, {transform_indices = @transform_1, window_bounds = array<i64: 1, 1, 128>}, {pipeline_mode = #tpu.pipeline_mode<synchronous>, transform_indices = @transform_2, window_bounds = array<i64: 16, 8>}, {pipeline_mode = #tpu.pipeline_mode<synchronous>, transform_indices = @transform_3, window_bounds = array<i64: 16, 1>}, {pipeline_mode = #tpu.pipeline_mode<synchronous>, transform_indices = @transform_4, window_bounds = array<i64: 3, 16, 48>}, {pipeline_mode = #tpu.pipeline_mode<synchronous>, transform_indices = @transform_5, window_bounds = array<i64: 3, 16, 1>}, {pipeline_mode = #tpu.pipeline_mode<synchronous>, transform_indices = @transform_6, window_bounds = array<i64: 3, 16, 16>}, {pipeline_mode = #tpu.pipeline_mode<synchronous>, transform_indices = @transform_7, window_bounds = array<i64: 3, 16, 1>}, {pipeline_mode = #tpu.pipeline_mode<synchronous>, transform_indices = @transform_8, window_bounds = array<i64: 4, 16>}, {pipeline_mode = #tpu.pipeline_mode<synchronous>, transform_indices = @transform_9, window_bounds = array<i64: 4, 1>}, {transform_indices = @transform_10, window_bounds = array<i64: 1, 4, 128>}]} {
    %c0 = arith.constant 0 : index
    %c0_0 = arith.constant 0 : index
    %c0_1 = arith.constant 0 : index
    %0 = vector.load %arg2[%c0, %c0_0, %c0_1] : memref<1x1x128xf32, #tpu.memory_space<vmem>>, vector<1x1x128xf32>
    %1 = vector.shape_cast %0 : vector<1x1x128xf32> to vector<1x128xf32>
    %2 = tpu.iota {dimensions = array<i32: 1>} : vector<1x128xi32>
    %c0_2 = arith.constant 0 : index
    %c0_3 = arith.constant 0 : index
    %3 = vector.load %arg3[%c0_2, %c0_3] : memref<16x8xbf16, #tpu.memory_space<vmem>>, vector<16x8xbf16>
    %c0_4 = arith.constant 0 : index
    %c0_5 = arith.constant 0 : index
    %c0_6 = arith.constant 0 : index
    %4 = vector.load %arg1[%c0_4, %c0_5, %c0_6] : memref<1x8x128xbf16, #tpu.memory_space<vmem>>, vector<1x8x128xbf16>
    %5 = vector.shape_cast %4 : vector<1x8x128xbf16> to vector<8x128xbf16>
    %cst = arith.constant dense<0.000000e+00> : vector<16x128xf32>
    %6 = tpu.matmul %3, %5, %cst {dimension_numbers = #tpu.dot_dimension_numbers<[1], [0], [0], [1], [0, 0, 1, 1], [], []>} : vector<16x8xbf16>, vector<8x128xbf16>, vector<16x128xf32> -> vector<16x128xf32>
    %c0_7 = arith.constant 0 : index
    %c0_8 = arith.constant 0 : index
    %7 = vector.load %arg4[%c0_7, %c0_8] : memref<16x1xf32, #tpu.memory_space<vmem>>, vector<16x1xf32>
    %8 = vector.broadcast %7 : vector<16x1xf32> to vector<16x128xf32>
    %9 = arith.addf %6, %8 : vector<16x128xf32>
    %c16_i32 = arith.constant 16 : i32
    %10 = vector.broadcast %c16_i32 : i32 to vector<1x128xi32>
    %11 = arith.cmpi slt, %2, %10 : vector<1x128xi32>
    %cst_9 = arith.constant 0.000000e+00 : f32
    %12 = vector.shape_cast %11 : vector<1x128xi1> to vector<1x128xi1>
    %13 = vector.broadcast %12 : vector<1x128xi1> to vector<16x128xi1>
    %14 = vector.broadcast %cst_9 : f32 to vector<16x128xf32>
    %15 = arith.select %13, %9, %14 : vector<16x128xi1>, vector<16x128xf32>
    %c0_10 = arith.constant 0 : index
    %c0_11 = arith.constant 0 : index
    %16 = vector.load %arg12[%c0_10, %c0_11] : memref<16x128xf32, #tpu.memory_space<vmem>>, vector<16x128xf32>
    tpu.vector_store %arg12[%c0_10, %c0_11], %15 {strides = array<i32>} : memref<16x128xf32, #tpu.memory_space<vmem>>, vector<16x128xf32>,
    %c0_12 = arith.constant 0 : index
    %c0_13 = arith.constant 0 : index
    %17 = vector.load %arg12[%c0_12, %c0_13] : memref<16x128xf32, #tpu.memory_space<vmem>>, vector<16x128xf32>
    %c1_i32 = arith.constant 1 : i32
    %18 = vector.broadcast %c1_i32 : i32 to vector<1x128xi32>
    %19 = arith.cmpi sge, %2, %18 : vector<1x128xi32>
    %c1_i32_14 = arith.constant 1 : i32
    %20 = tpu.dynamic_rotate %17 by %c1_i32_14 dim 1 : vector<16x128xf32>, i32 -> vector<16x128xf32>
    %cst_15 = arith.constant 0.000000e+00 : f32
    %21 = vector.shape_cast %19 : vector<1x128xi1> to vector<1x128xi1>
    %22 = vector.broadcast %21 : vector<1x128xi1> to vector<16x128xi1>
    %23 = vector.broadcast %cst_15 : f32 to vector<16x128xf32>
    %24 = arith.select %22, %20, %23 : vector<16x128xi1>, vector<16x128xf32>
    %c127_i32 = arith.constant 127 : i32
    %25 = vector.broadcast %c127_i32 : i32 to vector<1x128xi32>
    %26 = arith.cmpi slt, %2, %25 : vector<1x128xi32>
    %c127_i32_16 = arith.constant 127 : i32
    %27 = tpu.dynamic_rotate %17 by %c127_i32_16 dim 1 : vector<16x128xf32>, i32 -> vector<16x128xf32>
    %cst_17 = arith.constant 0.000000e+00 : f32
    %28 = vector.shape_cast %26 : vector<1x128xi1> to vector<1x128xi1>
    %29 = vector.broadcast %28 : vector<1x128xi1> to vector<16x128xi1>
    %30 = vector.broadcast %cst_17 : f32 to vector<16x128xf32>
    %31 = arith.select %29, %27, %30 : vector<16x128xi1>, vector<16x128xf32>
    %32 = arith.truncf %24 : vector<16x128xf32> to vector<16x128xbf16>
    %c0_18 = arith.constant 0 : index
    %c0_19 = arith.constant 0 : index
    %33 = vector.load %arg13[%c0_18, %c0_19] : memref<48x128xbf16, #tpu.memory_space<vmem>>, vector<16x128xbf16>
    tpu.vector_store %arg13[%c0_18, %c0_19], %32 {strides = array<i32>} : memref<48x128xbf16, #tpu.memory_space<vmem>>, vector<16x128xbf16>,
    %34 = arith.truncf %17 : vector<16x128xf32> to vector<16x128xbf16>
    %c16 = arith.constant 16 : index
    %c0_20 = arith.constant 0 : index
    %35 = vector.load %arg13[%c16, %c0_20] : memref<48x128xbf16, #tpu.memory_space<vmem>>, vector<16x128xbf16>
    tpu.vector_store %arg13[%c16, %c0_20], %34 {strides = array<i32>} : memref<48x128xbf16, #tpu.memory_space<vmem>>, vector<16x128xbf16>,
    %36 = arith.truncf %31 : vector<16x128xf32> to vector<16x128xbf16>
    %c32 = arith.constant 32 : index
    %c0_21 = arith.constant 0 : index
    %37 = vector.load %arg13[%c32, %c0_21] : memref<48x128xbf16, #tpu.memory_space<vmem>>, vector<16x128xbf16>
    tpu.vector_store %arg13[%c32, %c0_21], %36 {strides = array<i32>} : memref<48x128xbf16, #tpu.memory_space<vmem>>, vector<16x128xbf16>,
    %c0_22 = arith.constant 0 : index
    %c0_23 = arith.constant 0 : index
    %c0_24 = arith.constant 0 : index
    %38 = vector.load %arg5[%c0_22, %c0_23, %c0_24] : memref<3x16x48xbf16, #tpu.memory_space<vmem>>, vector<1x16x48xbf16>
    %39 = vector.shape_cast %38 : vector<1x16x48xbf16> to vector<16x48xbf16>
    %c0_25 = arith.constant 0 : index
    %c0_26 = arith.constant 0 : index
    %40 = vector.load %arg13[%c0_25, %c0_26] : memref<48x128xbf16, #tpu.memory_space<vmem>>, vector<48x128xbf16>
    %cst_27 = arith.constant dense<0.000000e+00> : vector<16x128xf32>
    %41 = tpu.matmul %39, %40, %cst_27 {dimension_numbers = #tpu.dot_dimension_numbers<[1], [0], [0], [1], [0, 0, 1, 1], [], []>} : vector<16x48xbf16>, vector<48x128xbf16>, vector<16x128xf32> -> vector<16x128xf32>
    %c0_28 = arith.constant 0 : index
    %c0_29 = arith.constant 0 : index
    %c0_30 = arith.constant 0 : index
    %42 = vector.load %arg6[%c0_28, %c0_29, %c0_30] : memref<3x16x1xf32, #tpu.memory_space<vmem>>, vector<1x16x1xf32>
    %43 = vector.shape_cast %42 : vector<1x16x1xf32> to vector<16x1xf32>
    %44 = vector.broadcast %43 : vector<16x1xf32> to vector<16x128xf32>
    %45 = arith.addf %41, %44 : vector<16x128xf32>
    %cst_31 = arith.constant 0.000000e+00 : f32
    %46 = vector.broadcast %cst_31 : f32 to vector<16x128xf32>
    %47 = arith.maximumf %45, %46 : vector<16x128xf32>
    %c0_32 = arith.constant 0 : index
    %c0_33 = arith.constant 0 : index
    %c0_34 = arith.constant 0 : index
    %48 = vector.load %arg7[%c0_32, %c0_33, %c0_34] : memref<3x16x16xbf16, #tpu.memory_space<vmem>>, vector<1x16x16xbf16>
    %49 = vector.shape_cast %48 : vector<1x16x16xbf16> to vector<16x16xbf16>
    %50 = arith.truncf %47 : vector<16x128xf32> to vector<16x128xbf16>
    %cst_35 = arith.constant dense<0.000000e+00> : vector<16x128xf32>
    %51 = tpu.matmul %49, %50, %cst_35 {dimension_numbers = #tpu.dot_dimension_numbers<[1], [0], [0], [1], [0, 0, 1, 1], [], []>} : vector<16x16xbf16>, vector<16x128xbf16>, vector<16x128xf32> -> vector<16x128xf32>
    %c0_36 = arith.constant 0 : index
    %c0_37 = arith.constant 0 : index
    %c0_38 = arith.constant 0 : index
    %52 = vector.load %arg8[%c0_36, %c0_37, %c0_38] : memref<3x16x1xf32, #tpu.memory_space<vmem>>, vector<1x16x1xf32>
    %53 = vector.shape_cast %52 : vector<1x16x1xf32> to vector<16x1xf32>
    %54 = vector.broadcast %53 : vector<16x1xf32> to vector<16x128xf32>
    %55 = arith.addf %51, %54 : vector<16x128xf32>
    %56 = arith.addf %17, %55 : vector<16x128xf32>
    %57 = vector.broadcast %1 : vector<1x128xf32> to vector<16x128xf32>
    %58 = arith.mulf %56, %57 : vector<16x128xf32>
    %c0_39 = arith.constant 0 : index
    %c0_40 = arith.constant 0 : index
    %59 = vector.load %arg12[%c0_39, %c0_40] : memref<16x128xf32, #tpu.memory_space<vmem>>, vector<16x128xf32>
    tpu.vector_store %arg12[%c0_39, %c0_40], %58 {strides = array<i32>} : memref<16x128xf32, #tpu.memory_space<vmem>>, vector<16x128xf32>,
    %c0_41 = arith.constant 0 : index
    %c0_42 = arith.constant 0 : index
    %60 = vector.load %arg12[%c0_41, %c0_42] : memref<16x128xf32, #tpu.memory_space<vmem>>, vector<16x128xf32>
    %c2_i32 = arith.constant 2 : i32
    %61 = vector.broadcast %c2_i32 : i32 to vector<1x128xi32>
    %62 = arith.cmpi sge, %2, %61 : vector<1x128xi32>
    %c2_i32_43 = arith.constant 2 : i32
    %63 = tpu.dynamic_rotate %60 by %c2_i32_43 dim 1 : vector<16x128xf32>, i32 -> vector<16x128xf32>
    %cst_44 = arith.constant 0.000000e+00 : f32
    %64 = vector.shape_cast %62 : vector<1x128xi1> to vector<1x128xi1>
    %65 = vector.broadcast %64 : vector<1x128xi1> to vector<16x128xi1>
    %66 = vector.broadcast %cst_44 : f32 to vector<16x128xf32>
    %67 = arith.select %65, %63, %66 : vector<16x128xi1>, vector<16x128xf32>
    %c126_i32 = arith.constant 126 : i32
    %68 = vector.broadcast %c126_i32 : i32 to vector<1x128xi32>
    %69 = arith.cmpi slt, %2, %68 : vector<1x128xi32>
    %c126_i32_45 = arith.constant 126 : i32
    %70 = tpu.dynamic_rotate %60 by %c126_i32_45 dim 1 : vector<16x128xf32>, i32 -> vector<16x128xf32>
    %cst_46 = arith.constant 0.000000e+00 : f32
    %71 = vector.shape_cast %69 : vector<1x128xi1> to vector<1x128xi1>
    %72 = vector.broadcast %71 : vector<1x128xi1> to vector<16x128xi1>
    %73 = vector.broadcast %cst_46 : f32 to vector<16x128xf32>
    %74 = arith.select %72, %70, %73 : vector<16x128xi1>, vector<16x128xf32>
    %75 = arith.truncf %67 : vector<16x128xf32> to vector<16x128xbf16>
    %c0_47 = arith.constant 0 : index
    %c0_48 = arith.constant 0 : index
    %76 = vector.load %arg13[%c0_47, %c0_48] : memref<48x128xbf16, #tpu.memory_space<vmem>>, vector<16x128xbf16>
    tpu.vector_store %arg13[%c0_47, %c0_48], %75 {strides = array<i32>} : memref<48x128xbf16, #tpu.memory_space<vmem>>, vector<16x128xbf16>,
    %77 = arith.truncf %60 : vector<16x128xf32> to vector<16x128xbf16>
    %c16_49 = arith.constant 16 : index
    %c0_50 = arith.constant 0 : index
    %78 = vector.load %arg13[%c16_49, %c0_50] : memref<48x128xbf16, #tpu.memory_space<vmem>>, vector<16x128xbf16>
    tpu.vector_store %arg13[%c16_49, %c0_50], %77 {strides = array<i32>} : memref<48x128xbf16, #tpu.memory_space<vmem>>, vector<16x128xbf16>,
    %79 = arith.truncf %74 : vector<16x128xf32> to vector<16x128xbf16>
    %c32_51 = arith.constant 32 : index
    %c0_52 = arith.constant 0 : index
    %80 = vector.load %arg13[%c32_51, %c0_52] : memref<48x128xbf16, #tpu.memory_space<vmem>>, vector<16x128xbf16>
    tpu.vector_store %arg13[%c32_51, %c0_52], %79 {strides = array<i32>} : memref<48x128xbf16, #tpu.memory_space<vmem>>, vector<16x128xbf16>,
    %c1 = arith.constant 1 : index
    %c0_53 = arith.constant 0 : index
    %c0_54 = arith.constant 0 : index
    %81 = vector.load %arg5[%c1, %c0_53, %c0_54] : memref<3x16x48xbf16, #tpu.memory_space<vmem>>, vector<1x16x48xbf16>
    %82 = vector.shape_cast %81 : vector<1x16x48xbf16> to vector<16x48xbf16>
    %c0_55 = arith.constant 0 : index
    %c0_56 = arith.constant 0 : index
    %83 = vector.load %arg13[%c0_55, %c0_56] : memref<48x128xbf16, #tpu.memory_space<vmem>>, vector<48x128xbf16>
    %cst_57 = arith.constant dense<0.000000e+00> : vector<16x128xf32>
    %84 = tpu.matmul %82, %83, %cst_57 {dimension_numbers = #tpu.dot_dimension_numbers<[1], [0], [0], [1], [0, 0, 1, 1], [], []>} : vector<16x48xbf16>, vector<48x128xbf16>, vector<16x128xf32> -> vector<16x128xf32>
    %c1_58 = arith.constant 1 : index
    %c0_59 = arith.constant 0 : index
    %c0_60 = arith.constant 0 : index
    %85 = vector.load %arg6[%c1_58, %c0_59, %c0_60] : memref<3x16x1xf32, #tpu.memory_space<vmem>>, vector<1x16x1xf32>
    %86 = vector.shape_cast %85 : vector<1x16x1xf32> to vector<16x1xf32>
    %87 = vector.broadcast %86 : vector<16x1xf32> to vector<16x128xf32>
    %88 = arith.addf %84, %87 : vector<16x128xf32>
    %cst_61 = arith.constant 0.000000e+00 : f32
    %89 = vector.broadcast %cst_61 : f32 to vector<16x128xf32>
    %90 = arith.maximumf %88, %89 : vector<16x128xf32>
    %c1_62 = arith.constant 1 : index
    %c0_63 = arith.constant 0 : index
    %c0_64 = arith.constant 0 : index
    %91 = vector.load %arg7[%c1_62, %c0_63, %c0_64] : memref<3x16x16xbf16, #tpu.memory_space<vmem>>, vector<1x16x16xbf16>
    %92 = vector.shape_cast %91 : vector<1x16x16xbf16> to vector<16x16xbf16>
    %93 = arith.truncf %90 : vector<16x128xf32> to vector<16x128xbf16>
    %cst_65 = arith.constant dense<0.000000e+00> : vector<16x128xf32>
    %94 = tpu.matmul %92, %93, %cst_65 {dimension_numbers = #tpu.dot_dimension_numbers<[1], [0], [0], [1], [0, 0, 1, 1], [], []>} : vector<16x16xbf16>, vector<16x128xbf16>, vector<16x128xf32> -> vector<16x128xf32>
    %c1_66 = arith.constant 1 : index
    %c0_67 = arith.constant 0 : index
    %c0_68 = arith.constant 0 : index
    %95 = vector.load %arg8[%c1_66, %c0_67, %c0_68] : memref<3x16x1xf32, #tpu.memory_space<vmem>>, vector<1x16x1xf32>
    %96 = vector.shape_cast %95 : vector<1x16x1xf32> to vector<16x1xf32>
    %97 = vector.broadcast %96 : vector<16x1xf32> to vector<16x128xf32>
    %98 = arith.addf %94, %97 : vector<16x128xf32>
    %99 = arith.addf %60, %98 : vector<16x128xf32>
    %100 = vector.broadcast %1 : vector<1x128xf32> to vector<16x128xf32>
    %101 = arith.mulf %99, %100 : vector<16x128xf32>
    %c0_69 = arith.constant 0 : index
    %c0_70 = arith.constant 0 : index
    %102 = vector.load %arg12[%c0_69, %c0_70] : memref<16x128xf32, #tpu.memory_space<vmem>>, vector<16x128xf32>
    tpu.vector_store %arg12[%c0_69, %c0_70], %101 {strides = array<i32>} : memref<16x128xf32, #tpu.memory_space<vmem>>, vector<16x128xf32>,
    %c0_71 = arith.constant 0 : index
    %c0_72 = arith.constant 0 : index
    %103 = vector.load %arg12[%c0_71, %c0_72] : memref<16x128xf32, #tpu.memory_space<vmem>>, vector<16x128xf32>
    %c4_i32 = arith.constant 4 : i32
    %104 = vector.broadcast %c4_i32 : i32 to vector<1x128xi32>
    %105 = arith.cmpi sge, %2, %104 : vector<1x128xi32>
    %c4_i32_73 = arith.constant 4 : i32
    %106 = tpu.dynamic_rotate %103 by %c4_i32_73 dim 1 : vector<16x128xf32>, i32 -> vector<16x128xf32>
    %cst_74 = arith.constant 0.000000e+00 : f32
    %107 = vector.shape_cast %105 : vector<1x128xi1> to vector<1x128xi1>
    %108 = vector.broadcast %107 : vector<1x128xi1> to vector<16x128xi1>
    %109 = vector.broadcast %cst_74 : f32 to vector<16x128xf32>
    %110 = arith.select %108, %106, %109 : vector<16x128xi1>, vector<16x128xf32>
    %c124_i32 = arith.constant 124 : i32
    %111 = vector.broadcast %c124_i32 : i32 to vector<1x128xi32>
    %112 = arith.cmpi slt, %2, %111 : vector<1x128xi32>
    %c124_i32_75 = arith.constant 124 : i32
    %113 = tpu.dynamic_rotate %103 by %c124_i32_75 dim 1 : vector<16x128xf32>, i32 -> vector<16x128xf32>
    %cst_76 = arith.constant 0.000000e+00 : f32
    %114 = vector.shape_cast %112 : vector<1x128xi1> to vector<1x128xi1>
    %115 = vector.broadcast %114 : vector<1x128xi1> to vector<16x128xi1>
    %116 = vector.broadcast %cst_76 : f32 to vector<16x128xf32>
    %117 = arith.select %115, %113, %116 : vector<16x128xi1>, vector<16x128xf32>
    %118 = arith.truncf %110 : vector<16x128xf32> to vector<16x128xbf16>
    %c0_77 = arith.constant 0 : index
    %c0_78 = arith.constant 0 : index
    %119 = vector.load %arg13[%c0_77, %c0_78] : memref<48x128xbf16, #tpu.memory_space<vmem>>, vector<16x128xbf16>
    tpu.vector_store %arg13[%c0_77, %c0_78], %118 {strides = array<i32>} : memref<48x128xbf16, #tpu.memory_space<vmem>>, vector<16x128xbf16>,
    %120 = arith.truncf %103 : vector<16x128xf32> to vector<16x128xbf16>
    %c16_79 = arith.constant 16 : index
    %c0_80 = arith.constant 0 : index
    %121 = vector.load %arg13[%c16_79, %c0_80] : memref<48x128xbf16, #tpu.memory_space<vmem>>, vector<16x128xbf16>
    tpu.vector_store %arg13[%c16_79, %c0_80], %120 {strides = array<i32>} : memref<48x128xbf16, #tpu.memory_space<vmem>>, vector<16x128xbf16>,
    %122 = arith.truncf %117 : vector<16x128xf32> to vector<16x128xbf16>
    %c32_81 = arith.constant 32 : index
    %c0_82 = arith.constant 0 : index
    %123 = vector.load %arg13[%c32_81, %c0_82] : memref<48x128xbf16, #tpu.memory_space<vmem>>, vector<16x128xbf16>
    tpu.vector_store %arg13[%c32_81, %c0_82], %122 {strides = array<i32>} : memref<48x128xbf16, #tpu.memory_space<vmem>>, vector<16x128xbf16>,
    %c2 = arith.constant 2 : index
    %c0_83 = arith.constant 0 : index
    %c0_84 = arith.constant 0 : index
    %124 = vector.load %arg5[%c2, %c0_83, %c0_84] : memref<3x16x48xbf16, #tpu.memory_space<vmem>>, vector<1x16x48xbf16>
    %125 = vector.shape_cast %124 : vector<1x16x48xbf16> to vector<16x48xbf16>
    %c0_85 = arith.constant 0 : index
    %c0_86 = arith.constant 0 : index
    %126 = vector.load %arg13[%c0_85, %c0_86] : memref<48x128xbf16, #tpu.memory_space<vmem>>, vector<48x128xbf16>
    %cst_87 = arith.constant dense<0.000000e+00> : vector<16x128xf32>
    %127 = tpu.matmul %125, %126, %cst_87 {dimension_numbers = #tpu.dot_dimension_numbers<[1], [0], [0], [1], [0, 0, 1, 1], [], []>} : vector<16x48xbf16>, vector<48x128xbf16>, vector<16x128xf32> -> vector<16x128xf32>
    %c2_88 = arith.constant 2 : index
    %c0_89 = arith.constant 0 : index
    %c0_90 = arith.constant 0 : index
    %128 = vector.load %arg6[%c2_88, %c0_89, %c0_90] : memref<3x16x1xf32, #tpu.memory_space<vmem>>, vector<1x16x1xf32>
    %129 = vector.shape_cast %128 : vector<1x16x1xf32> to vector<16x1xf32>
    %130 = vector.broadcast %129 : vector<16x1xf32> to vector<16x128xf32>
    %131 = arith.addf %127, %130 : vector<16x128xf32>
    %cst_91 = arith.constant 0.000000e+00 : f32
    %132 = vector.broadcast %cst_91 : f32 to vector<16x128xf32>
    %133 = arith.maximumf %131, %132 : vector<16x128xf32>
    %c2_92 = arith.constant 2 : index
    %c0_93 = arith.constant 0 : index
    %c0_94 = arith.constant 0 : index
    %134 = vector.load %arg7[%c2_92, %c0_93, %c0_94] : memref<3x16x16xbf16, #tpu.memory_space<vmem>>, vector<1x16x16xbf16>
    %135 = vector.shape_cast %134 : vector<1x16x16xbf16> to vector<16x16xbf16>
    %136 = arith.truncf %133 : vector<16x128xf32> to vector<16x128xbf16>
    %cst_95 = arith.constant dense<0.000000e+00> : vector<16x128xf32>
    %137 = tpu.matmul %135, %136, %cst_95 {dimension_numbers = #tpu.dot_dimension_numbers<[1], [0], [0], [1], [0, 0, 1, 1], [], []>} : vector<16x16xbf16>, vector<16x128xbf16>, vector<16x128xf32> -> vector<16x128xf32>
    %c2_96 = arith.constant 2 : index
    %c0_97 = arith.constant 0 : index
    %c0_98 = arith.constant 0 : index
    %138 = vector.load %arg8[%c2_96, %c0_97, %c0_98] : memref<3x16x1xf32, #tpu.memory_space<vmem>>, vector<1x16x1xf32>
    %139 = vector.shape_cast %138 : vector<1x16x1xf32> to vector<16x1xf32>
    %140 = vector.broadcast %139 : vector<16x1xf32> to vector<16x128xf32>
    %141 = arith.addf %137, %140 : vector<16x128xf32>
    %142 = arith.addf %103, %141 : vector<16x128xf32>
    %143 = vector.broadcast %1 : vector<1x128xf32> to vector<16x128xf32>
    %144 = arith.mulf %142, %143 : vector<16x128xf32>
    %c0_99 = arith.constant 0 : index
    %c0_100 = arith.constant 0 : index
    %145 = vector.load %arg12[%c0_99, %c0_100] : memref<16x128xf32, #tpu.memory_space<vmem>>, vector<16x128xf32>
    tpu.vector_store %arg12[%c0_99, %c0_100], %144 {strides = array<i32>} : memref<16x128xf32, #tpu.memory_space<vmem>>, vector<16x128xf32>,
    %c0_101 = arith.constant 0 : index
    %c0_102 = arith.constant 0 : index
    %146 = vector.load %arg9[%c0_101, %c0_102] : memref<4x16xbf16, #tpu.memory_space<vmem>>, vector<4x16xbf16>
    %c0_103 = arith.constant 0 : index
    %c0_104 = arith.constant 0 : index
    %147 = vector.load %arg12[%c0_103, %c0_104] : memref<16x128xf32, #tpu.memory_space<vmem>>, vector<16x128xf32>
    %148 = arith.truncf %147 : vector<16x128xf32> to vector<16x128xbf16>
    %cst_105 = arith.constant dense<0.000000e+00> : vector<4x128xf32>
    %149 = tpu.matmul %146, %148, %cst_105 {dimension_numbers = #tpu.dot_dimension_numbers<[1], [0], [0], [1], [0, 0, 1, 1], [], []>} : vector<4x16xbf16>, vector<16x128xbf16>, vector<4x128xf32> -> vector<4x128xf32>
    %c0_106 = arith.constant 0 : index
    %c0_107 = arith.constant 0 : index
    %150 = vector.load %arg10[%c0_106, %c0_107] : memref<4x1xf32, #tpu.memory_space<vmem>>, vector<4x1xf32>
    %151 = vector.broadcast %150 : vector<4x1xf32> to vector<4x128xf32>
    %152 = arith.addf %149, %151 : vector<4x128xf32>
    %153 = vector.broadcast %1 : vector<1x128xf32> to vector<4x128xf32>
    %154 = arith.mulf %152, %153 : vector<4x128xf32>
    %c0_108 = arith.constant 0 : index
    %c0_109 = arith.constant 0 : index
    %c0_110 = arith.constant 0 : index
    %155 = vector.load %arg11[%c0_108, %c0_109, %c0_110] : memref<1x4x128xf32, #tpu.memory_space<vmem>>, vector<1x4x128xf32>
    %156 = vector.shape_cast %155 : vector<1x4x128xf32> to vector<4x128xf32>
    %157 = vector.shape_cast %154 : vector<4x128xf32> to vector<1x4x128xf32>
    tpu.vector_store %arg11[%c0_108, %c0_109, %c0_110], %157 {strides = array<i32>} : memref<1x4x128xf32, #tpu.memory_space<vmem>>, vector<1x4x128xf32>,
    return
  }
  func.func @transform_0(%arg0: i32) -> (i32, i32, i32) {
    %c0_i32 = arith.constant 0 : i32
    %c0_i32_0 = arith.constant 0 : i32
    %c0_i32_1 = arith.constant 0 : i32
    return %arg0, %c0_i32, %c0_i32_0 : i32, i32, i32
  }
  func.func @transform_1(%arg0: i32) -> (i32, i32, i32) {
    %c0_i32 = arith.constant 0 : i32
    %c0_i32_0 = arith.constant 0 : i32
    %c0_i32_1 = arith.constant 0 : i32
    return %arg0, %c0_i32, %c0_i32_0 : i32, i32, i32
  }
  func.func @transform_2(%arg0: i32) -> (i32, i32) {
    %c0_i32 = arith.constant 0 : i32
    %c0_i32_0 = arith.constant 0 : i32
    %c0_i32_1 = arith.constant 0 : i32
    return %c0_i32, %c0_i32_0 : i32, i32
  }
  func.func @transform_3(%arg0: i32) -> (i32, i32) {
    %c0_i32 = arith.constant 0 : i32
    %c0_i32_0 = arith.constant 0 : i32
    %c0_i32_1 = arith.constant 0 : i32
    return %c0_i32, %c0_i32_0 : i32, i32
  }
  func.func @transform_4(%arg0: i32) -> (i32, i32, i32) {
    %c0_i32 = arith.constant 0 : i32
    %c0_i32_0 = arith.constant 0 : i32
    %c0_i32_1 = arith.constant 0 : i32
    %c0_i32_2 = arith.constant 0 : i32
    return %c0_i32, %c0_i32_0, %c0_i32_1 : i32, i32, i32
  }
  func.func @transform_5(%arg0: i32) -> (i32, i32, i32) {
    %c0_i32 = arith.constant 0 : i32
    %c0_i32_0 = arith.constant 0 : i32
    %c0_i32_1 = arith.constant 0 : i32
    %c0_i32_2 = arith.constant 0 : i32
    return %c0_i32, %c0_i32_0, %c0_i32_1 : i32, i32, i32
  }
  func.func @transform_6(%arg0: i32) -> (i32, i32, i32) {
    %c0_i32 = arith.constant 0 : i32
    %c0_i32_0 = arith.constant 0 : i32
    %c0_i32_1 = arith.constant 0 : i32
    %c0_i32_2 = arith.constant 0 : i32
    return %c0_i32, %c0_i32_0, %c0_i32_1 : i32, i32, i32
  }
  func.func @transform_7(%arg0: i32) -> (i32, i32, i32) {
    %c0_i32 = arith.constant 0 : i32
    %c0_i32_0 = arith.constant 0 : i32
    %c0_i32_1 = arith.constant 0 : i32
    %c0_i32_2 = arith.constant 0 : i32
    return %c0_i32, %c0_i32_0, %c0_i32_1 : i32, i32, i32
  }
  func.func @transform_8(%arg0: i32) -> (i32, i32) {
    %c0_i32 = arith.constant 0 : i32
    %c0_i32_0 = arith.constant 0 : i32
    %c0_i32_1 = arith.constant 0 : i32
    return %c0_i32, %c0_i32_0 : i32, i32
  }
  func.func @transform_9(%arg0: i32) -> (i32, i32) {
    %c0_i32 = arith.constant 0 : i32
    %c0_i32_0 = arith.constant 0 : i32
    %c0_i32_1 = arith.constant 0 : i32
    return %c0_i32, %c0_i32_0 : i32, i32
  }
  func.func @transform_10(%arg0: i32) -> (i32, i32, i32) {
    %c0_i32 = arith.constant 0 : i32
    %c0_i32_0 = arith.constant 0 : i32
    %c0_i32_1 = arith.constant 0 : i32
    return %arg0, %c0_i32, %c0_i32_0 : i32, i32, i32
  }
}

</mosaic_0001>

<bundles_post_ra>
// kernel: tpu_custom_call.1
= control target key start
LH: loop header
LB: loop body
LE: loop exit
PB: predicated region body
PF: predicated region fallthrough
CT: control target
= control target key end

     0   :  { %15 = vsyncpa [#allocation5], 0  ;;  %s1530_s0 = inlined_call_operand.vmem [shape: bf16[2,8,128], index: 0, kind: input, shape index: {}]   ;;  %s1531_s1 = inlined_call_operand.vmem [shape: f32[2,1,128], index: 1, kind: input, shape index: {}]   ;;  %s1532_s2 = inlined_call_operand.vmem [shape: bf16[16,8], index: 2, kind: input, shape index: {}]   ;;  %s1533_s3 = inlined_call_operand.vmem [shape: f32[16,1], index: 3, kind: input, shape index: {}]   ;;  %s1534_s4 = inlined_call_operand.vmem [shape: bf16[3,16,48], index: 4, kind: input, shape index: {}]   ;;  %s1535_s5 = inlined_call_operand.vmem [shape: f32[3,16,1], index: 5, kind: input, shape index: {}]   ;;  %s1536_s6 = inlined_call_operand.vmem [shape: bf16[3,16,16], index: 6, kind: input, shape index: {}]   ;;  %s1537_s7 = inlined_call_operand.vmem [shape: f32[3,16,1], index: 7, kind: input, shape index: {}]   ;;  %s1538_s8 = inlined_call_operand.vmem [shape: bf16[4,16], index: 8, kind: input, shape index: {}]   ;;  %s1539_s9 = inlined_call_operand.vmem [shape: f32[4,1], index: 9, kind: input, shape index: {}]   ;;  %s1540_s10 = inlined_call_operand.hbm [shape: f32[2,4,128], index: 10, kind: output, shape index: {}]  }
   0x1   :  { %17 = vsyncpa [#allocation5 + $0x1], 0  ;;  %s1329_s13 = smov 0   ;;  %s1331_s14 = smov 0  }
   0x2   :  { %s1333_s15 = smov 0   ;;  %s1335_s16 = smov 0  }
   0x3 LB: > { %s1350_s17 = sadd.s32 4294967295, %s1265_s16   ;;  %s958_s18 = sadd.s32 4294967294, %s1265_s16   ;;  %s1265_s16 = sphi %s1335_s16, %s1548_s16   ;;  %s1261_s15 = sphi %s1333_s15, %s1547_s15   ;;  %s1257_s14 = sphi %s1331_s14, %s1546_s14   ;;  %s1253_s13 = sphi %s1329_s13, %s1545_s13  }
   0x4   : > { %s1354_s19 = sadd.s32 1, %s1265_s16   ;;  %s250_s20 = sadd.s32 1, %s1261_s15 }
   0x5   : > { %s247_s21 = ssub.s32 %s1265_s16, %s1354_s19  ;;  %p260_p0 = scmp.ne.s32.totalorder %s1261_s15, %s1257_s14 }
   0x6   : > { %p248_p1 = scmp.eq.s32.totalorder %s247_s21, 0  ;;  %p261_p2 = scmp.eq.s32.totalorder %s1350_s17, 1 }
   0x7   : > { %p266_p3 = scmp.ne.s32.totalorder %s1257_s14, %s1253_s13  ;;  %p267_p4 = scmp.eq.s32.totalorder %s958_s18, 1 }
   0x8   : > { %s1365_s22 = scalar_select %p248_p1, %s1261_s15, %s250_s20  }
   0x9   : > { %p1367_p5 = por %p261_p2, %p260_p0  ;;  %p1371_p6 = por %p267_p4, %p266_p3 }
   0xa   : > { %1541 = sst [smem:[#allocation7_spill]] %s1365_s22  ;;  %p961_p7 = scmp.ge.s32.totalorder %s1265_s16, 1 }
   0xb   : > { %p322_p8 = scmp.lt.s32.totalorder %s1265_s16, 3 }
   0xd   : > { %p323_p9 = pnand %p961_p7, %p322_p8 }
   0xe   : > { %p362_p10 = scmp.lt.s32.totalorder (!%p323_p9), %s1350_s17, 1  ;;  %s1268_s22 = smov (!%p323_p9), 127  }
   0xf   : > { %326 = sbr.rel (%p323_p9) target bundleno = 1585 (0x631), region = 60  ;;  %s1270_s12 = smov (!%p323_p9), 2  }
  0x10   : > { %s1271_s18 = smov (!%p323_p9), 126  }
  0x14   : > { %v376_v0 = vld [vmem:[%s1533_s3] sm:$0xff]  ;;  %v1267_v1 = vmov 0   ;;  %s1382_s27 = scalar_select %p362_p10, %s1350_s17, 1  ;;  %vm397_vm0 = vcmask 1043456   ;;  %v377_v5 = vld [vmem:[%s1533_s3 + $0x8] sm:$0xff]  ;;  %vm393_vm1 = vcmask 64512   ;;  %v371_v8 = vlaneseq }
  0x15   : > { %1169 = vset.pattern.permute.xlu0 %v1267_v1  ;;  %1180 = vset.pattern.permute.xlu2 %v1267_v1  ;;  %v1056_v4 = vld [vmem:[%s1532_s2] sm:$0xff]  ;;  %v463_v21 = vld [vmem:[%s1535_s5 + $0x8] sm:$0xff]  ;;  %vm497_vm5 = vcmask 392192   ;;  %v993_v38 = vld [vmem:[%s1535_s5 + $0x10] sm:$0xff]  ;;  %vm537_vm6 = vcmask 130048  }
  0x16   : > { %380 = vperm.xlu0 %1169, %v376_v0   ;;  %1181 = vset.pattern.permute.xlu1 %v1267_v1  ;;  %s963_s28 = sshll.u32 %s1382_s27, 2  ;;  %s368_s11 = scalar_lea.vmem %s1531_s1, %s1382_s27  ;;  %v520_v6 = vld [vmem:[%s1537_s7] sm:$0xff]  ;;  %v1401_v10 = vand.u32 127, %v371_v8  ;;  %v521_v37 = vld [vmem:[%s1537_s7 + $0x8] sm:$0xff]  ;;  %v1015_v39 = vld [vmem:[%s1537_s7 + $0x18] sm:$0xff] }
  0x17   : > { %s365_s20 = scalar_lea.vmem %s1530_s0, %s963_s28  ;;  %s1269_s28 = smov 1   ;;  %v462_v19 = vld [vmem:[%s1535_s5] sm:$0xff]  ;;  %v1045_v46 = vld [vmem:[%s1537_s7 + $0x28] sm:$0xff]  ;;  %v1014_v1 = vld [vmem:[%s1537_s7 + $0x10] sm:$0xff] }
  0x18   : > { %v375_v2 = vld [vmem:[%s365_s20] sm:$0xf]  ;;  %vm415_vm2 = vcmp.lt.s32.totalorder %v1401_v10, 16  ;;  %466 = vperm.xlu2 %1180, %v462_v19   ;;  %vm433_vm3 = vcmp.lt.s32.totalorder %v1401_v10, 127  ;;  %vm424_vm4 = vcmp.ge.s32.totalorder %v1401_v10, 1  ;;  %vm575_vm7 = vcmp.lt.s32.totalorder %v1401_v10, 126 }
  0x19   : > { %v399_v3 = vsel %vm397_vm0, %v375_v2, 0  ;;  %v1057_v36 = vld [vmem:[%s1534_s4] sm:$0xff]  ;;  %v994_v2 = vld [vmem:[%s1535_s5 + $0x18] sm:$0xff]  ;;  %vm566_vm8 = vcmp.ge.s32.totalorder %v1401_v10, 2  ;;  %v1062_v19 = vld [vmem:[%s1534_s4 + $0x8] sm:$0xff]  ;;  %vm716_vm9 = vcmp.lt.s32.totalorder %v1401_v10, 124 }
  0x1a   : > { %408 = vmatpush.bf16.msra.mxu0 %v399_v3  ;;  %v1023_v42 = vld [vmem:[%s1535_s5 + $0x20] sm:$0xff]  ;;  %vm707_vm10 = vcmp.ge.s32.totalorder %v1401_v10, 4  ;;  %s1053_s20 = sshll.u32 %s1350_s17, 2 }
  0x1b   : > { %v1061_v51 = vld [vmem:[%s1536_s6] sm:$0xff]  ;;  %s885_s21 = scalar_lea.hbm %s1540_s10, %s1053_s20 }
  0x1c   : > { %v1448_v57 = vld [vmem:[%s368_s11] ss:$0 sm:$0xff]  ;;  %s889_s29 = sshll.u32 %s885_s21, 4  ;;  %s890_s29 = int_to_ptr.hbm [resolvable:$true] %s889_s29 }
  0x1d   : > { %968 = vmatmul.msk.bf16.vlgmr.msra.gmra.mxu0 %vm393_vm1, %v1056_v4 }
  0x1e   : > { %385 = vperm.xlu0 %1169, %v377_v5  }
  0x20   : > { %471 = vperm.xlu2 %1180, %v463_v21  }
  0x26   : > { %524 = vperm.xlu0 %1169, %v520_v6  }
  0x72   : > { %v467_v40 = vpop.permute.xlu2 %466 }
  0x7a   : > { %v472_v44 = vpop.permute.xlu2 %471 }
  0x88   : > { %v381_v7 = vpop.permute.xlu0 %380 }
  0x90   : > { %v386_v12 = vpop.permute.xlu0 %385 }
  0x98   : > { %v525_v53 = vpop.permute.xlu0 %524 }
  0x9a   : > { %v410_v9 = vpop.f32.mrf.mxu0 }
  0x9b   : > { %v411_v11 = vadd.f32 %v410_v9, %v381_v7 }
  0x9d   : > { %v1404_v15 = vsel %vm415_vm2, %v411_v11, 0.0 }
  0xa2   : > { %v412_v13 = vpop.f32.mrf.mxu0 }
  0xa3   : > { %v413_v14 = vadd.f32 %v412_v13, %v386_v12 }
  0xa5   : > { %v1406_v16 = vsel %vm415_vm2, %v413_v14, 0.0 }
  0xa6   : > { %v1080_v17 = vpack.c.bf16 %v1406_v16, %v1404_v15  ;;  %v1170_v18 = vpack.i.bf16 %v1406_v16, %v1404_v15 }
  0xa8   : > { %1117 = vst [vmem:[#allocation3] sm:$0xff] %v1080_v17   ;;  %1171 = vrot.lane.b32.xlu1 %v1170_v18, %s1268_s22  ;;  %s1272_s22 = smov 4  }
  0xaf   : > { %v1059_v34 = vld [vmem:[#allocation3] sm:$0xff] }
  0xb0   : > { %1176 = vrot.lane.b32.xlu1 %v1170_v18, %s1269_s28  ;;  %s1273_s28 = smov 124  }
  0xb8   : > { %529 = vperm.xlu1 %1181, %v521_v37  }
  0xc0   : > { %610 = vperm.xlu1 %1181, %v993_v38  }
  0xc8   : > { %674 = vperm.xlu1 %1181, %v1015_v39  }
  0xd0   : > { %751 = vperm.xlu1 %1181, %v1023_v42   ;;  %v1044_v42 = vld [vmem:[%s1537_s7 + $0x20] sm:$0xff] }
  0xd8   : > { %815 = vperm.xlu1 %1181, %v1045_v46  }
 0x11a   : > { %v1172_v20 = vpop.permute.xlu1 %1171 }
 0x11b   : > { %v1174_v22 = vunpack.i.h.bf16 %v1172_v20  ;;  %v1173_v23 = vunpack.i.l.bf16 %v1172_v20 }
 0x11d   : > { %v441_v24 = vsel %vm433_vm3, %v1174_v22, 0.0  ;;  %v440_v25 = vsel %vm433_vm3, %v1173_v23, 0.0 }
 0x11e   : > { %v1085_v26 = vpack.c.bf16 %v441_v24, %v440_v25 }
 0x120   : > { %1118 = vst [vmem:[#allocation3 + $0x8] sm:$0xff] %v1085_v26  }
 0x122   : > { %v1177_v27 = vpop.permute.xlu1 %1176 }
 0x123   : > { %v1179_v28 = vunpack.i.h.bf16 %v1177_v27  ;;  %v1178_v29 = vunpack.i.l.bf16 %v1177_v27 }
 0x125   : > { %v432_v30 = vsel %vm424_vm4, %v1179_v28, 0.0  ;;  %v431_v31 = vsel %vm424_vm4, %v1178_v29, 0.0  ;;  %v1066_v29 = vld [vmem:[%s1536_s6 + $0x8] sm:$0xff] }
 0x126   : > { %v1075_v32 = vpack.c.bf16 %v432_v30, %v431_v31 }
 0x127   : > { %v1060_v33 = vld [vmem:[#allocation3 + $0x8] sm:$0xff] }
 0x128   : > { %1076 = vst [vmem:[#allocation3 + $0x10] sm:$0xff] %v1075_v32   ;;  %506 = vmatpush.bf16.msra.mxu1 %v1060_v33 }
 0x12a   : > { %v530_v55 = vpop.permute.xlu1 %529 }
 0x12c   : > { %507 = vmatpush.bf16.msra.mxu1 %v1059_v34 }
 0x12f   : > { %v1058_v35 = vld [vmem:[#allocation3 + $0x10] sm:$0xff] }
 0x130   : > { %508 = vmatpush.bf16.msra.mxu1 %v1058_v35 }
 0x132   : > { %v611_v21 = vpop.permute.xlu1 %610 }
 0x133   : > { %985 = vmatmul.msk.bf16.vlgmr.msra.gmra.mxu1 %vm497_vm5, %v1057_v36 }
 0x13a   : > { %v675_v33 = vpop.permute.xlu1 %674 }
 0x1b0   : > { %v510_v41 = vpop.f32.mrf.mxu1 }
 0x1b1   : > { %v511_v43 = vadd.f32 %v510_v41, %v467_v40 }
 0x1b3   : > { %v515_v48 = vmax.f32 %v511_v43, 0.0  ;;  %v1024_v43 = vld [vmem:[%s1535_s5 + $0x28] sm:$0xff] }
 0x1b8   : > { %v512_v45 = vpop.f32.mrf.mxu1 }
 0x1b9   : > { %v513_v47 = vadd.f32 %v512_v45, %v472_v44  ;;  %v850_v44 = vld [vmem:[%s1539_s9] sm:$0xf] }
 0x1bb   : > { %v516_v49 = vmax.f32 %v513_v47, 0.0 }
 0x1bd   : > { %v519_v50 = vpack.c.bf16 %v516_v49, %v515_v48 }
 0x1bf   : > { %548 = vmatpush.bf16.msra.mxu2 %v519_v50 }
 0x1c2   : > { %990 = vmatmul.msk.bf16.vlgmr.msra.gmra.mxu2 %vm537_vm6, %v1061_v51 }
 0x245   : > { %v550_v52 = vpop.f32.mrf.mxu2 }
 0x246   : > { %v551_v54 = vadd.f32 %v550_v52, %v525_v53 }
 0x248   : > { %v555_v58 = vadd.f32 %v551_v54, %v1404_v15 }
 0x24a   : > { %v560_v61 = vmul.f32 %v1448_v57, %v555_v58 }
 0x24d   : > { %v552_v56 = vpop.f32.mrf.mxu2 }
 0x24e   : > { %v553_v59 = vadd.f32 %v552_v56, %v530_v55 }
 0x250   : > { %v556_v60 = vadd.f32 %v553_v59, %v1406_v16 }
 0x252   : > { %v561_v62 = vmul.f32 %v1448_v57, %v556_v60 }
 0x254   : > { %v1095_v63 = vpack.c.bf16 %v561_v62, %v560_v61  ;;  %v1187_v0 = vpack.i.bf16 %v561_v62, %v560_v61 }
 0x256   : > { %1119 = vst [vmem:[#allocation3] sm:$0xff] %v1095_v63   ;;  %1188 = vrot.lane.b32.xlu0 %v1187_v0, %s1270_s12  ;;  %1183 = vrot.lane.b32.xlu2 %v1187_v0, %s1271_s18  ;;  %v752_v63 = vpop.permute.xlu1 %751  ;;  %s359_s12 = sand.u32 1, %s1257_s14  }
 0x257   : > { %s962_s18 = sshll.u32 %s359_s12, 2  ;;  %s875_s30 = scalar_lea.sflag [#allocation5], %s359_s12 }
 0x258   : > { %s361_s25 = scalar_lea.vmem [#allocation4], %s962_s18  ;;  %s1223_s18 = scalar_lea.hbm %s1540_s10, 8 }
 0x259   : > { %s887_s26 = sshll.u32 %s361_s25, 4  ;;  %s888_s26 = int_to_ptr.vmem [resolvable:$true] %s887_s26 }
 0x25d   : > { %v1064_v11 = vld [vmem:[#allocation3] sm:$0xff] }
 0x25e   : > { %669 = vperm.xlu0 %1169, %v1014_v1   ;;  %615 = vperm.xlu2 %1180, %v994_v2  }
 0x2b0   : > { %v1184_v3 = vpop.permute.xlu2 %1183 }
 0x2b1   : > { %v1186_v4 = vunpack.i.h.bf16 %v1184_v3  ;;  %v1185_v5 = vunpack.i.l.bf16 %v1184_v3 }
 0x2b3   : > { %v583_v6 = vsel %vm575_vm7, %v1186_v4, 0.0  ;;  %v582_v7 = vsel %vm575_vm7, %v1185_v5, 0.0 }
 0x2b4   : > { %v1100_v8 = vpack.c.bf16 %v583_v6, %v582_v7  ;;  %v1071_v6 = vld [vmem:[%s1536_s6 + $0x10] sm:$0xff] }
 0x2b6   : > { %1120 = vst [vmem:[#allocation3 + $0x8] sm:$0xff] %v1100_v8  }
 0x2b8   : > { %v616_v23 = vpop.permute.xlu2 %615 }
 0x2bd   : > { %v1065_v9 = vld [vmem:[#allocation3 + $0x8] sm:$0xff] }
 0x2be   : > { %649 = vmatpush.bf16.msra.mxu3 %v1065_v9 }
 0x2c2   : > { %650 = vmatpush.bf16.msra.mxu3 %v1064_v11  ;;  %v816_v11 = vpop.permute.xlu1 %815 }
 0x2c8   : > { %v1189_v12 = vpop.permute.xlu0 %1188 }
 0x2c9   : > { %v1191_v13 = vunpack.i.h.bf16 %v1189_v12  ;;  %v1190_v14 = vunpack.i.l.bf16 %v1189_v12 }
 0x2cb   : > { %v574_v15 = vsel %vm566_vm8, %v1191_v13, 0.0  ;;  %v573_v16 = vsel %vm566_vm8, %v1190_v14, 0.0 }
 0x2cc   : > { %v1090_v17 = vpack.c.bf16 %v574_v15, %v573_v16 }
 0x2ce   : > { %1091 = vst [vmem:[#allocation3 + $0x10] sm:$0xff] %v1090_v17  }
 0x2d0   : > { %v670_v31 = vpop.permute.xlu0 %669 }
 0x2d5   : > { %v1063_v18 = vld [vmem:[#allocation3 + $0x10] sm:$0xff] }
 0x2d6   : > { %651 = vmatpush.bf16.msra.mxu3 %v1063_v18 }
 0x2d9   : > { %1011 = vmatmul.msk.bf16.vlgmr.msra.gmra.mxu3 %vm497_vm5, %v1062_v19  ;;  %v846_v19 = vld [vmem:[%s1538_s8] sm:$0x3] }
 0x35c   : > { %v653_v20 = vpop.f32.mrf.mxu3 }
 0x35d   : > { %v654_v22 = vadd.f32 %v653_v20, %v611_v21 }
 0x35f   : > { %v658_v26 = vmax.f32 %v654_v22, 0.0 }
 0x364   : > { %v655_v24 = vpop.f32.mrf.mxu3 }
 0x365   : > { %v656_v25 = vadd.f32 %v655_v24, %v616_v23 }
 0x367   : > { %v659_v27 = vmax.f32 %v656_v25, 0.0 }
 0x369   : > { %v663_v28 = vpack.c.bf16 %v659_v27, %v658_v26 }
 0x36b   : > { %692 = vmatpush.bf16.msrb.mxu0 %v663_v28 }
 0x36e   : > { %1020 = vmatmul.msk.bf16.vlgmr.msrb.gmra.mxu0 %vm537_vm6, %v1066_v29 }
 0x3eb   : > { %v694_v30 = vpop.f32.mrf.mxu0 }
 0x3ec   : > { %v695_v32 = vadd.f32 %v694_v30, %v670_v31 }
 0x3ee   : > { %v699_v35 = vadd.f32 %v695_v32, %v560_v61  ;;  %v1067_v61 = vld [vmem:[%s1534_s4 + $0x10] sm:$0xff] }
 0x3f0   : > { %v701_v38 = vmul.f32 %v1448_v57, %v699_v35 }
 0x3f3   : > { %v696_v34 = vpop.f32.mrf.mxu0 }
 0x3f4   : > { %v697_v36 = vadd.f32 %v696_v34, %v675_v33 }
 0x3f6   : > { %v700_v37 = vadd.f32 %v697_v36, %v561_v62 }
 0x3f8   : > { %v702_v39 = vmul.f32 %v1448_v57, %v700_v37 }
 0x3fa   : > { %v1110_v40 = vpack.c.bf16 %v702_v39, %v701_v38  ;;  %v1197_v41 = vpack.i.bf16 %v702_v39, %v701_v38 }
 0x3fc   : > { %1121 = vst [vmem:[#allocation3] sm:$0xff] %v1110_v40   ;;  %1198 = vrot.lane.b32.xlu0 %v1197_v41, %s1272_s22  ;;  %1193 = vrot.lane.b32.xlu2 %v1197_v41, %s1273_s28  ;;  %s1217_s22 = sshra.s32 %s890_s29, 4  ;;  %s1218_s22 = int_to_ptr.hbm [resolvable:$true] %s1217_s22 }
 0x3fd   : > { %s1219_s17 = scalar_lea.hbm %s1218_s22, 4  ;;  %p1224_p0 = scmp.lt.s32.totalorder %s1218_s22, %s1540_s10 }
 0x3fe   : > { %p1220_p11 = scmp.ne.s32.totalorder %s1218_s22, %s1219_s17  ;;  %p1225_p1 = scmp.lt.s32.totalorder %s1223_s18, %s1219_s17 }
 0x400   : > { %p1221_p12 = pnand %p1220_p11, %p1367_p5  ;;  %p1226_p2 = por %p1225_p1, %p1224_p0 }
 0x402   : > { %p1222_p13 = pneg %p1221_p12 }
 0x403   : > { %v1069_v52 = vld [vmem:[#allocation3] sm:$0xff] }
 0x404   : > { %810 = vperm.xlu0 %1169, %v1044_v42   ;;  %756 = vperm.xlu2 %1180, %v1024_v43   ;;  %p1227_p3 = pnand %p1226_p2, %p1222_p13 }
 0x40c   : > { %853 = vperm.xlu2 %1180, %v850_v44  }
 0x456   : > { %v1194_v45 = vpop.permute.xlu2 %1193 }
 0x457   : > { %v1196_v46 = vunpack.i.h.bf16 %v1194_v45  ;;  %v1195_v47 = vunpack.i.l.bf16 %v1194_v45 }
 0x459   : > { %v724_v48 = vsel %vm716_vm9, %v1196_v46, 0.0  ;;  %v723_v49 = vsel %vm716_vm9, %v1195_v47, 0.0 }
 0x45a   : > { %v1115_v50 = vpack.c.bf16 %v724_v48, %v723_v49 }
 0x45c   : > { %1122 = vst [vmem:[#allocation3 + $0x8] sm:$0xff] %v1115_v50  }
 0x45e   : > { %v757_v1 = vpop.permute.xlu2 %756 }
 0x463   : > { %v1070_v51 = vld [vmem:[#allocation3 + $0x8] sm:$0xff] }
 0x464   : > { %790 = vmatpush.bf16.msrb.mxu2 %v1070_v51 }
 0x466   : > { %v854_v20 = vpop.permute.xlu2 %853 }
 0x468   : > { %791 = vmatpush.bf16.msrb.mxu2 %v1069_v52 }
 0x46e   : > { %v1199_v53 = vpop.permute.xlu0 %1198 }
 0x46f   : > { %v1201_v54 = vunpack.i.h.bf16 %v1199_v53  ;;  %v1200_v55 = vunpack.i.l.bf16 %v1199_v53 }
 0x471   : > { %v715_v56 = vsel %vm707_vm10, %v1201_v54, 0.0  ;;  %v714_v58 = vsel %vm707_vm10, %v1200_v55, 0.0 }
 0x472   : > { %v1105_v59 = vpack.c.bf16 %v715_v56, %v714_v58 }
 0x474   : > { %1106 = vst [vmem:[#allocation3 + $0x10] sm:$0xff] %v1105_v59  }
 0x476   : > { %v811_v8 = vpop.permute.xlu0 %810 }
 0x47b   : > { %v1068_v60 = vld [vmem:[#allocation3 + $0x10] sm:$0xff] }
 0x47c   : > { %792 = vmatpush.bf16.msrb.mxu2 %v1068_v60 }
 0x47f   : > { %1041 = vmatmul.msk.bf16.vlgmr.msrb.gmra.mxu2 %vm497_vm5, %v1067_v61 }
 0x502   : > { %v794_v62 = vpop.f32.mrf.mxu2 }
 0x503   : > { %v795_v0 = vadd.f32 %v794_v62, %v752_v63 }
 0x505   : > { %v799_v3 = vmax.f32 %v795_v0, 0.0 }
 0x50a   : > { %v796_v10 = vpop.f32.mrf.mxu2 }
 0x50b   : > { %v797_v2 = vadd.f32 %v796_v10, %v757_v1 }
 0x50d   : > { %v800_v4 = vmax.f32 %v797_v2, 0.0 }
 0x50f   : > { %v804_v5 = vpack.c.bf16 %v800_v4, %v799_v3 }
 0x511   : > { %833 = vmatpush.bf16.msrb.mxu1 %v804_v5 }
 0x514   : > { %1050 = vmatmul.msk.bf16.vlgmr.msrb.gmra.mxu1 %vm537_vm6, %v1071_v6 }
 0x591   : > { %v835_v7 = vpop.f32.mrf.mxu1 }
 0x592   : > { %v836_v9 = vadd.f32 %v835_v7, %v811_v8 }
 0x594   : > { %v840_v13 = vadd.f32 %v836_v9, %v701_v38 }
 0x596   : > { %v842_v16 = vmul.f32 %v1448_v57, %v840_v13 }
 0x599   : > { %v837_v12 = vpop.f32.mrf.mxu1 }
 0x59a   : > { %v838_v14 = vadd.f32 %v837_v12, %v816_v11 }
 0x59c   : > { %v841_v15 = vadd.f32 %v838_v14, %v702_v39 }
 0x59e   : > { %v843_v17 = vmul.f32 %v1448_v57, %v841_v15 }
 0x5a0   : > { %v849_v18 = vpack.c.bf16 %v843_v17, %v842_v16 }
 0x5a2   : > { %866 = vmatpush.bf16.msrb.mxu3 %v849_v18 }
 0x5a5   : > { %1051 = vmatmul.msk.bf16.vlgmr.msrb.gmra.mxu3 %vm537_vm6, %v846_v19 }
 0x628   : > { %v868_v21 = vpop.f32.mrf.mxu3 }
 0x629   : > { %v869_v22 = vadd.f32 %v868_v21, %v854_v20 }
 0x62b   : > { %v872_v23 = vmul.f32 %v1448_v57, %v869_v22 }
 0x62d   : > { %873 = vst [vmem:[%s361_s25] sm:$0xf] %v872_v23 }
 0x62e   : > { %1230 = shalt.err (!%p1227_p3)
}
 0x62f   : > { %1123 = dma.vmem_to_hbm [thread:$0]  (%p1367_p5), %s888_s26, 64, %s890_s29, %s875_s30  }
 0x630   : > { %v870_v57 = vpop.f32.mrf.mxu3 }
 0x631 PF: > { %p1129_p4 = scmp.ge.s32.totalorder %s1265_s16, 2  ;;  %s901_s12 = sand.u32 1, %s1253_s13  }
 0x632   : > { %s902_s21 = scalar_lea.sflag [#allocation5], %s901_s12 }
 0x633   : > { %p1126_p7 = pnand %p1129_p4, %p1371_p6 }
 0x635   : > { %p1127_p8 = pneg %p1126_p7 }
 0x637   : > { %1248 = dma.done.wait (%p1127_p8), %s902_s21, 64  }
 0x638   : > { %1250 = vsyncadd (%p1127_p8), %s902_s21, 4294967232  ;;  %s1544_s25 = sld [smem:[#allocation7_spill]]  ;;  %p20_p9 = scmp.ge.s32.totalorder %s1354_s19, 4  }
 0x639   : > { %s1545_s13 = smov %s1257_s14  ;;  %s1546_s14 = smov %s1261_s15 }
 0x63a   : > { %s1548_s16 = smov %s1354_s19  ;;  %22 = sbr.rel (!%p20_p9) target bundleno = 3 (0x3), region = 106 }
 0x63e   : > { %s1547_s15 = smov %s1544_s25 }
 0x63f   :  { %908 = vsyncpa [#allocation5], 1 }
 0x640   :  { %910 = vsyncpa [#allocation5 + $0x1], 1 }

</bundles_post_ra>
